<compile_context>
chip_gen: v6e
topology: v6e:2x2x1
jax: 0.10.0
libtpu: 0.0.40
codegen_flags: <defaults>
</compile_context>

<pallas_src>
import math

import jax
import jax.numpy as jnp
from jax.experimental import pallas as pl
from jax.experimental.pallas import tpu as pltpu


def _vit_embed_kernel(x_ref, w_ref, pos_ref, o_ref):
    # x_ref:   (rows, Kp) bf16 flattened patch rows (cls rows are all-zero)
    # w_ref:   (Kp, D)    bf16 pre-transposed conv weight (resident, Buffered(1))
    # pos_ref: (rows, D)  f32  per-token additive rows: cls+pos[0] / pos[i]+bias
    # o_ref:   (rows, D)  full-tile, lane-dense aligned store in out_dtype
    y = jax.lax.dot_general(
        x_ref[...], w_ref[...],
        dimension_numbers=(((1,), (0,)), ((), ())),
        preferred_element_type=jnp.float32)
    o_ref[...] = (y + pos_ref[...]).astype(o_ref.dtype)


def vit_input_layer(x, conv_w, conv_b, cls_token, pos_emb, *, num_patch_row,
                    matmul_dtype=jnp.bfloat16, out_dtype=jnp.bfloat16,
                    target_rows=1024):
    """x: (B, C, H, W) NCHW.  Returns z_0: (B, N+1, D), cls token first."""
    B, C, H, W = x.shape
    nr = num_patch_row
    assert H == W and H % nr == 0, "square image divisible by num_patch_row required"
    D = conv_w.shape[0]
    ps = H // nr
    N = nr * nr
    T = N + 1                          # tokens per image (cls + patches)
    K = C * ps * ps
    Kp = -(-K // 128) * 128            # lane-align the contraction dim
    M = B * T

    # --- patchify glue: cast to the matmul dtype FIRST so XLA fuses the cast
    # into the transpose/pad pass (one bf16-width HBM write instead of f32).
    # TODO(synk): fold this gather into the BlockSpec/DMA pipeline (grid over
    # (B, nr) on the raw NCHW image) to avoid the extra HBM round trip.
    xb = x.astype(matmul_dtype)
    patches = xb.reshape(B, C, nr, ps, nr, ps).transpose(0, 2, 4, 1, 3, 5)
    patches = patches.reshape(B, N, K)
    # Single pad: leading all-zero row per image (cls slot -> matmul yields 0)
    # plus zero columns up to the lane-aligned K (contribute nothing).
    patches = jnp.pad(patches, ((0, 0), (1, 0), (0, Kp - K)))
    patches = patches.reshape(M, Kp)

    # Conv weight (D, C, ps, ps) -> pre-transposed (Kp, D) once, bf16.
    w_t = conv_w.reshape(D, K).T
    if Kp != K:
        w_t = jnp.pad(w_t, ((0, Kp - K), (0, 0)))
    w_t = w_t.astype(matmul_dtype)

    # Per-token additive rows (f32): row 0 = cls + pos[0]; rows 1..N = pos + bias.
    pos = pos_emb.reshape(T, D).astype(jnp.float32)
    tok_rows = jnp.concatenate(
        [cls_token.reshape(1, D).astype(jnp.float32) + pos[0:1],
         pos[1:] + conv_b.reshape(1, D).astype(jnp.float32)], axis=0)   # (T, D)

    # Row-tile sizing: rows must be a multiple of T (so the resident pos tile
    # repeats exactly per image) and of the sublane packing of matmul_dtype.
    sub = {4: 8, 2: 16, 1: 32}.get(jnp.dtype(matmul_dtype).itemsize, 8)
    base = T * (sub // math.gcd(T, sub))
    n_base_needed = -(-M // base)                        # ceil(M / base)
    mult = min(max(target_rows // base, 1), n_base_needed)
    if n_base_needed >= 2:
        # Keep >= 2 grid steps so both v7x TensorCores get work.
        mult = max(1, min(mult, n_base_needed // 2))
    rows = base * mult
    n_blocks = -(-M // rows)
    M_pad = n_blocks * rows
    if M_pad != M:
        patches = jnp.pad(patches, ((0, M_pad - M), (0, 0)))

    pos_tile = jnp.tile(tok_rows, (rows // T, 1))        # (rows, D), VMEM-resident

    # VMEM working set: double-buffered patch / output blocks, single-buffered
    # (Buffered(1)) resident weight and pos tile, plus headroom for Mosaic.
    itm = jnp.dtype(matmul_dtype).itemsize
    ito = jnp.dtype(out_dtype).itemsize
    est = (2 * rows * Kp * itm          # patch blocks (double buffered)
           + Kp * D * itm               # weight (single buffered)
           + rows * D * 4               # pos tile (single buffered, f32)
           + 2 * rows * D * ito)        # output blocks (double buffered)
    vmem_limit = int(min(128 << 20, max(32 << 20, est + (8 << 20))))

    out = pl.pallas_call(
        _vit_embed_kernel,
        out_shape=jax.ShapeDtypeStruct((M_pad, D), out_dtype),
        grid_spec=pltpu.PrefetchScalarGridSpec(
            num_scalar_prefetch=0,
            grid=(n_blocks,),
            in_specs=[
                pl.BlockSpec((rows, Kp), lambda i: (i, 0)),
                pl.BlockSpec((Kp, D), lambda i: (0, 0),
                             pipeline_mode=pl.Buffered(1)),
                pl.BlockSpec((rows, D), lambda i: (0, 0),
                             pipeline_mode=pl.Buffered(1)),
            ],
            out_specs=pl.BlockSpec((rows, D), lambda i: (i, 0)),
        ),
        compiler_params=pltpu.CompilerParams(
            dimension_semantics=("parallel",),
            vmem_limit_bytes=vmem_limit),
    )(patches, w_t, pos_tile)

    if M_pad != M:
        out = out[:M]
    return out.reshape(B, T, D)


def _reference(x, conv_w, conv_b, cls_token, pos_emb, *, num_patch_row,
               matmul_dtype=jnp.float32):
    """Pure-JAX reproduction of the PyTorch forward (via lax.conv)."""
    ps = x.shape[2] // num_patch_row
    z = jax.lax.conv_general_dilated(
        x.astype(matmul_dtype), conv_w.astype(matmul_dtype),
        window_strides=(ps, ps), padding="VALID",
        dimension_numbers=("NCHW", "OIHW", "NCHW"),
        preferred_element_type=jnp.float32)
    z = z + conv_b.reshape(1, -1, 1, 1)
    B, D = z.shape[0], z.shape[1]
    z = z.reshape(B, D, -1).transpose(0, 2, 1)              # (B, N, D)
    cls = jnp.broadcast_to(cls_token.reshape(1, 1, D), (B, 1, D))
    z = jnp.concatenate([cls, z], axis=1)
    return z + pos_emb.reshape(1, -1, D)


if __name__ == "__main__":
    # Small config consistent with the module:
    #   in_channels=4, emb_dim=128, num_patch_row=2, image_size=16
    #   -> patch_size=8, num_patch=4, tokens=5, K = 4*8*8 = 256
    B, C, img, nr, D = 2, 4, 16, 2, 128
    ps = img // nr
    N = nr * nr

    key = jax.random.PRNGKey(0)
    k_x, k_w, k_b, k_cls, k_pos = jax.random.split(key, 5)

    x = jax.random.normal(k_x, (B, C, img, img), dtype=jnp.float32)
    conv_w = jax.random.normal(k_w, (D, C, ps, ps), dtype=jnp.float32) * 0.02
    conv_b = jax.random.normal(k_b, (D,), dtype=jnp.float32) * 0.02
    cls_token = jax.random.normal(k_cls, (1, 1, D), dtype=jnp.float32)
    pos_emb = jax.random.normal(k_pos, (1, N + 1, D), dtype=jnp.float32)

    z0 = vit_input_layer(x, conv_w, conv_b, cls_token, pos_emb, num_patch_row=nr)
    z0 = jax.block_until_ready(z0)
    assert z0.shape == (B, N + 1, D), z0.shape
    z0_f = z0.astype(jnp.float32)

    # Tight check against a reference using the same bf16 matmul inputs
    # (f32 accumulation), then a loose semantic check against full f32.
    ref_bf16 = _reference(x, conv_w, conv_b, cls_token, pos_emb,
                          num_patch_row=nr, matmul_dtype=jnp.bfloat16)
    assert jnp.allclose(z0_f, ref_bf16, atol=2e-2, rtol=2e-2), \
        "mismatch vs bf16 reference"

    ref_f32 = _reference(x, conv_w, conv_b, cls_token, pos_emb, num_patch_row=nr)
    assert jnp.allclose(z0_f, ref_f32, atol=5e-2, rtol=5e-2), \
        "mismatch vs f32 reference"

    print("KERNEL_OK")
</pallas_src>

<mosaic_0001>
module attributes {stable_mosaic.version = 11 : i64} {
  func.func @_vit_embed_kernel(%arg0: i32, %arg1: memref<80x256xbf16, #tpu.memory_space<vmem>>, %arg2: memref<256x128xbf16, #tpu.memory_space<vmem>>, %arg3: memref<80x128xf32, #tpu.memory_space<vmem>>, %arg4: memref<80x128xbf16, #tpu.memory_space<vmem>>) attributes {dimension_semantics = [#tpu.dimension_semantics<parallel>], iteration_bounds = array<i64: 1>, scalar_prefetch = 0 : i64, scratch_operands = 0 : i64, tpu.core_type = #tpu.core_type<tc>, window_params = [{transform_indices = @transform_0, window_bounds = array<i64: 80, 256>}, {pipeline_mode = #tpu.pipeline_mode<synchronous>, transform_indices = @transform_1, window_bounds = array<i64: 256, 128>}, {pipeline_mode = #tpu.pipeline_mode<synchronous>, transform_indices = @transform_2, window_bounds = array<i64: 80, 128>}, {transform_indices = @transform_3, window_bounds = array<i64: 80, 128>}]} {
    %c0 = arith.constant 0 : index
    %c0_0 = arith.constant 0 : index
    %0 = vector.load %arg1[%c0, %c0_0] : memref<80x256xbf16, #tpu.memory_space<vmem>>, vector<80x256xbf16>
    %c0_1 = arith.constant 0 : index
    %c0_2 = arith.constant 0 : index
    %1 = vector.load %arg2[%c0_1, %c0_2] : memref<256x128xbf16, #tpu.memory_space<vmem>>, vector<256x128xbf16>
    %cst = arith.constant dense<0.000000e+00> : vector<80x128xf32>
    %2 = tpu.matmul %0, %1, %cst {dimension_numbers = #tpu.dot_dimension_numbers<[1], [0], [0], [1], [0, 0, 1, 1], [], []>} : vector<80x256xbf16>, vector<256x128xbf16>, vector<80x128xf32> -> vector<80x128xf32>
    %c0_3 = arith.constant 0 : index
    %c0_4 = arith.constant 0 : index
    %3 = vector.load %arg3[%c0_3, %c0_4] : memref<80x128xf32, #tpu.memory_space<vmem>>, vector<80x128xf32>
    %4 = arith.addf %2, %3 : vector<80x128xf32>
    %5 = arith.truncf %4 : vector<80x128xf32> to vector<80x128xbf16>
    %c0_5 = arith.constant 0 : index
    %c0_6 = arith.constant 0 : index
    %6 = vector.load %arg4[%c0_5, %c0_6] : memref<80x128xbf16, #tpu.memory_space<vmem>>, vector<80x128xbf16>
    tpu.vector_store %arg4[%c0_5, %c0_6], %5 {strides = array<i32>} : memref<80x128xbf16, #tpu.memory_space<vmem>>, vector<80x128xbf16>,
    return
  }
  func.func @transform_0(%arg0: i32) -> (i32, i32) {
    %c0_i32 = arith.constant 0 : i32
    %c0_i32_0 = arith.constant 0 : i32
    return %arg0, %c0_i32 : i32, i32
  }
  func.func @transform_1(%arg0: i32) -> (i32, i32) {
    %c0_i32 = arith.constant 0 : i32
    %c0_i32_0 = arith.constant 0 : i32
    %c0_i32_1 = arith.constant 0 : i32
    return %c0_i32, %c0_i32_0 : i32, i32
  }
  func.func @transform_2(%arg0: i32) -> (i32, i32) {
    %c0_i32 = arith.constant 0 : i32
    %c0_i32_0 = arith.constant 0 : i32
    %c0_i32_1 = arith.constant 0 : i32
    return %c0_i32, %c0_i32_0 : i32, i32
  }
  func.func @transform_3(%arg0: i32) -> (i32, i32) {
    %c0_i32 = arith.constant 0 : i32
    %c0_i32_0 = arith.constant 0 : i32
    return %arg0, %c0_i32 : i32, i32
  }
}

</mosaic_0001>

<bundles_post_ra>
// kernel: tpu_custom_call.1
= control target key start
LH: loop header
LB: loop body
LE: loop exit
PB: predicated region body
PF: predicated region fallthrough
CT: control target
= control target key end

     0   :  { %8 = vsyncpa [#allocation3], 0  ;;  %s704_s0 = inlined_call_operand.hbm [shape: bf16[80,256], index: 0, kind: input, shape index: {}]   ;;  %s705_s1 = inlined_call_operand.hbm [shape: bf16[256,128], index: 1, kind: input, shape index: {}]   ;;  %s706_s2 = inlined_call_operand.hbm [shape: f32[80,128], index: 2, kind: input, shape index: {}]   ;;  %s707_s3 = inlined_call_operand.hbm [shape: bf16[80,128], index: 3, kind: output, shape index: {}]  }
   0x1   :  { %9 = vsyncpa [#allocation6], 0 }
   0x2   :  { %10 = vsyncpa [#allocation4], 0  ;;  %s658_s12 = smov [#allocation5]  }
   0x3   :  { %s28_s13 = sshll.u32 %s658_s12, 4  ;;  %s29_s13 = int_to_ptr.vmem [resolvable:$true] %s28_s13 }
   0x4   :  { %s580_s14 = scalar_lea.vmem %s29_s13, 2048  ;;  %p585_p1 = scmp.lt.s32.totalorder %s29_s13, %s29_s13 }
   0x5   :  { %p581_p0 = scmp.ne.s32.totalorder %s29_s13, %s580_s14  ;;  %p586_p2 = scmp.lt.s32.totalorder %s580_s14, %s580_s14 }
   0x7   :  { %p587_p3 = por %p586_p2, %p585_p1 }
   0x9   :  { %p588_p4 = pnand %p587_p3, %p581_p0 }
   0xb   :  { %591 = shalt.err (!%p588_p4)
}
   0xc   :  { %s659_s15 = smov 64   ;;  %s660_s16 = smov 4  }
   0xd   :  { %34 = dma.hbm_to_vmem [thread:$0]  %s705_s1, 2048, %s29_s13, [#allocation6], %s659_s15, %s659_s15, %s660_s16  }
   0xe   :  { %s661_s19 = smov [#allocation2]  }
   0xf   :  { %s16_s20 = sshll.u32 %s661_s19, 4  ;;  %s17_s20 = int_to_ptr.vmem [resolvable:$true] %s16_s20 }
  0x10   :  { %s600_s21 = scalar_lea.vmem %s17_s20, 1280  ;;  %p605_p6 = scmp.lt.s32.totalorder %s17_s20, %s17_s20 }
  0x11   :  { %p601_p5 = scmp.ne.s32.totalorder %s17_s20, %s600_s21  ;;  %p606_p7 = scmp.lt.s32.totalorder %s600_s21, %s600_s21 }
  0x13   :  { %p607_p8 = por %p606_p7, %p605_p6 }
  0x15   :  { %p608_p9 = pnand %p607_p8, %p601_p5 }
  0x17   :  { %611 = shalt.err (!%p608_p9)
}
  0x18   :  { %s662_s22 = smov 128   ;;  %s663_s23 = smov 8  }
  0x19   :  { %22 = dma.hbm_to_vmem [thread:$0]  %s704_s0, 1280, %s17_s20, [#allocation3], %s662_s22, %s662_s22, %s663_s23  }
  0x1a   :  { %s664_s26 = smov [#allocation7]  }
  0x1b   :  { %s40_s27 = sshll.u32 %s664_s26, 4  ;;  %s41_s27 = int_to_ptr.vmem [resolvable:$true] %s40_s27 }
  0x1c   :  { %s620_s1 = scalar_lea.vmem %s41_s27, 1280  ;;  %p625_p11 = scmp.lt.s32.totalorder %s41_s27, %s41_s27 }
  0x1d   :  { %p621_p10 = scmp.ne.s32.totalorder %s41_s27, %s620_s1  ;;  %p626_p12 = scmp.lt.s32.totalorder %s620_s1, %s620_s1 }
  0x1f   :  { %p627_p13 = por %p626_p12, %p625_p11 }
  0x21   :  { %p628_p0 = pnand %p627_p13, %p621_p10 }
  0x23   :  { %631 = shalt.err (!%p628_p0)
}
  0x24   :  { %46 = dma.hbm_to_vmem [thread:$0]  %s706_s2, 1280, %s41_s27, [#allocation6], %s662_s22, %s662_s22, %s663_s23  }
  0x25   :  { %652 = dma.done.wait [#allocation3], 1280  }
  0x26   :  { %653 = vsyncadd [#allocation3], 4294966016 }
  0x27   :  { %654 = dma.done.wait [#allocation6], 3328  }
  0x28   :  { %655 = vsyncadd [#allocation6], 4294963968  ;;  %v541_v0 = vld [vmem:[#allocation5 + $0x78] sm:$0xff]   ;;  %v543_v2 = vld [vmem:[#allocation5 + $0x70] sm:$0xff]   ;;  %s665_s0 = smov [#allocation8]  }
  0x29   :  { %v542_v1 = vld [vmem:[#allocation5 + $0x38] sm:$0xff]   ;;  %471 = vmatprep.subr.bf16.mxu0 %v541_v0  ;;  %517 = vmatprep.subr.bf16.mxu1 %v541_v0  ;;  %v544_v3 = vld [vmem:[#allocation5 + $0x30] sm:$0xff]   ;;  %v545_v4 = vld [vmem:[#allocation5 + $0x68] sm:$0xff]   ;;  %s383_s2 = sshll.u32 %s665_s0, 4  ;;  %s384_s2 = int_to_ptr.vmem [resolvable:$true] %s383_s2 }
  0x2a   :  { %472 = vmatpush3.bf16.msra.mxu0 %v542_v1  ;;  %525 = vmatpush3.bf16.msra.mxu1 %v542_v1  ;;  %v546_v5 = vld [vmem:[#allocation5 + $0x28] sm:$0xff]   ;;  %v547_v6 = vld [vmem:[#allocation5 + $0x60] sm:$0xff]   ;;  %v549_v8 = vld [vmem:[#allocation5 + $0x58] sm:$0xff]   ;;  %s632_s30 = scalar_lea.vmem %s384_s2, 640  ;;  %p637_p2 = scmp.lt.s32.totalorder %s384_s2, %s384_s2 }
  0x2b   :  { %473 = vmatprep.subr.bf16.mxu0 %v543_v2  ;;  %518 = vmatprep.subr.bf16.mxu1 %v543_v2  ;;  %v548_v7 = vld [vmem:[#allocation5 + $0x20] sm:$0xff]   ;;  %v550_v9 = vld [vmem:[#allocation5 + $0x18] sm:$0xff]   ;;  %v551_v10 = vld [vmem:[#allocation5 + $0x50] sm:$0xff]   ;;  %p633_p1 = scmp.ne.s32.totalorder %s384_s2, %s632_s30  ;;  %p638_p3 = scmp.lt.s32.totalorder %s632_s30, %s632_s30 }
  0x2c   :  { %v559_v11 = vld [vmem:[#allocation2 + $0x4] ss:$8 sps:$4 sm:$0xff]   ;;  %v562_v12 = vld [vmem:[#allocation2 + $0x34] ss:$8 sps:$4 sm:$0xff]   ;;  %v557_v18 = vld [vmem:[#allocation2] ss:$8 sps:$4 sm:$0xff]  }
  0x2d   :  { %v552_v13 = vld [vmem:[#allocation5 + $0x10] sm:$0xff]   ;;  %v553_v14 = vld [vmem:[#allocation5 + $0x48] sm:$0xff]   ;;  %287 = vmatprep.mubr.bf16.mxu0 %v559_v11  ;;  %311 = vmatprep.mubr.bf16.mxu1 %v562_v12  ;;  %v555_v16 = vld [vmem:[#allocation5 + $0x40] sm:$0xff]   ;;  %p639_p4 = por %p638_p3, %p637_p2 }
  0x2e   :  { %474 = vmatpush3.bf16.msra.mxu0 %v544_v3  ;;  %526 = vmatpush3.bf16.msra.mxu1 %v544_v3  ;;  %v554_v15 = vld [vmem:[#allocation5 + $0x8] sm:$0xff]   ;;  %v556_v17 = vld [vmem:[#allocation5] sm:$0xff]   ;;  %v566_v21 = vld [vmem:[#allocation2 + $0x44] ss:$8 sps:$4 sm:$0xff]  }
  0x2f   :  { %475 = vmatprep.subr.bf16.mxu0 %v545_v4  ;;  %519 = vmatprep.subr.bf16.mxu1 %v545_v4  ;;  %v560_v19 = vld [vmem:[#allocation2 + $0x30] ss:$8 sps:$4 sm:$0xff]   ;;  %v563_v20 = vld [vmem:[#allocation2 + $0x14] ss:$8 sps:$4 sm:$0xff]   ;;  %v568_v23 = vld [vmem:[#allocation2 + $0x40] ss:$8 sps:$4 sm:$0xff]   ;;  %p640_p5 = pnand %p639_p4, %p633_p1 }
  0x30   :  { %v565_v22 = vld [vmem:[#allocation2 + $0x10] ss:$8 sps:$4 sm:$0xff]   ;;  %v569_v24 = vld [vmem:[#allocation2 + $0x24] ss:$8 sps:$4 sm:$0xff]   ;;  %v571_v25 = vld [vmem:[#allocation2 + $0x20] ss:$8 sps:$4 sm:$0xff]  }
  0x31   :  { %v105_v32 = vld [vmem:[#allocation7 + $0x30] sm:$0xff]  ;;  %v99_v35 = vld [vmem:[#allocation7] sm:$0xff]  ;;  %v100_v36 = vld [vmem:[#allocation7 + $0x8] sm:$0xff] }
  0x32   :  { %476 = vmatpush3.bf16.msra.mxu0 %v546_v5  ;;  %527 = vmatpush3.bf16.msra.mxu1 %v546_v5  ;;  %v106_v38 = vld [vmem:[#allocation7 + $0x38] sm:$0xff]  ;;  %v107_v54 = vld [vmem:[#allocation7 + $0x40] sm:$0xff]  ;;  %v101_v57 = vld [vmem:[#allocation7 + $0x10] sm:$0xff] }
  0x33   :  { %477 = vmatprep.subr.bf16.mxu0 %v547_v6  ;;  %520 = vmatprep.subr.bf16.mxu1 %v547_v6  ;;  %v102_v58 = vld [vmem:[#allocation7 + $0x18] sm:$0xff]  ;;  %v108_v60 = vld [vmem:[#allocation7 + $0x48] sm:$0xff] }
  0x34   :  { %v104_v11 = vld [vmem:[#allocation7 + $0x28] sm:$0xff] }
  0x36   :  { %478 = vmatpush3.bf16.msra.mxu0 %v548_v7  ;;  %528 = vmatpush3.bf16.msra.mxu1 %v548_v7 }
  0x37   :  { %479 = vmatprep.subr.bf16.mxu0 %v549_v8  ;;  %521 = vmatprep.subr.bf16.mxu1 %v549_v8 }
  0x3a   :  { %480 = vmatpush3.bf16.msra.mxu0 %v550_v9  ;;  %529 = vmatpush3.bf16.msra.mxu1 %v550_v9 }
  0x3b   :  { %481 = vmatprep.subr.bf16.mxu0 %v551_v10  ;;  %522 = vmatprep.subr.bf16.mxu1 %v551_v10  ;;  %v103_v10 = vld [vmem:[#allocation7 + $0x20] sm:$0xff] }
  0x3e   :  { %482 = vmatpush3.bf16.msra.mxu0 %v552_v13  ;;  %530 = vmatpush3.bf16.msra.mxu1 %v552_v13 }
  0x3f   :  { %483 = vmatprep.subr.bf16.mxu0 %v553_v14  ;;  %523 = vmatprep.subr.bf16.mxu1 %v553_v14 }
  0x42   :  { %484 = vmatpush3.bf16.msra.mxu0 %v554_v15  ;;  %531 = vmatpush3.bf16.msra.mxu1 %v554_v15 }
  0x43   :  { %485 = vmatprep.subr.bf16.mxu0 %v555_v16  ;;  %524 = vmatprep.subr.bf16.mxu1 %v555_v16 }
  0x46   :  { %486 = vmatpush3.bf16.msra.mxu0 %v556_v17  ;;  %532 = vmatpush3.bf16.msra.mxu1 %v556_v17 }
  0x49   :  { %288 = vmatmul.mubr.bf16.vlgmr.msra.gmra.mxu0 %v557_v18  ;;  %312 = vmatmul.mubr.bf16.vlgmr.msra.gmra.mxu1 %v560_v19 }
  0x4a   :  { %295 = vmatprep.mubr.bf16.mxu0 %v563_v20  ;;  %319 = vmatprep.mubr.bf16.mxu1 %v566_v21 }
  0x51   :  { %296 = vmatmul.mubr.bf16.gmra.mxu0 %v565_v22  ;;  %320 = vmatmul.mubr.bf16.gmra.mxu1 %v568_v23 }
  0x52   :  { %303 = vmatprep.mubr.bf16.mxu0 %v569_v24 }
  0x59   :  { %304 = vmatmul.mubr.bf16.gmra.mxu0 %v571_v25 }
 0x109   :  { %v487_v26 = vpop.f32.mrf.mxu0  ;;  %v505_v27 = vpop.f32.mrf.mxu1 }
 0x10b   :  { %v488_v28 = vpop.f32.mrf.mxu0  ;;  %v506_v29 = vpop.f32.mrf.mxu1 }
 0x10c   :  { %v507_v30 = vadd.f32 %v506_v29, %v505_v27  ;;  %v489_v34 = vadd.f32 %v488_v28, %v487_v26 }
 0x10d   :  { %v490_v31 = vpop.f32.mrf.mxu0  ;;  %v508_v33 = vpop.f32.mrf.mxu1 }
 0x10e   :  { %v314_v40 = vadd.f32 %v507_v30, %v105_v32  ;;  %v290_v45 = vadd.f32 %v489_v34, %v99_v35 }
 0x10f   :  { %v491_v37 = vpop.f32.mrf.mxu0  ;;  %v509_v39 = vpop.f32.mrf.mxu1 }
 0x110   :  { %v492_v41 = vadd.f32 %v491_v37, %v490_v31  ;;  %v510_v42 = vadd.f32 %v509_v39, %v508_v33 }
 0x111   :  { %v493_v43 = vpop.f32.mrf.mxu0  ;;  %v511_v44 = vpop.f32.mrf.mxu1 }
 0x112   :  { %v293_v46 = vadd.f32 %v492_v41, %v100_v36  ;;  %v317_v47 = vadd.f32 %v510_v42, %v106_v38 }
 0x113   :  { %v494_v48 = vpop.f32.mrf.mxu0  ;;  %v512_v49 = vpop.f32.mrf.mxu1 }
 0x114   :  { %v445_v50 = vpack.c.bf16 %v293_v46, %v290_v45  ;;  %v460_v51 = vpack.c.bf16 %v317_v47, %v314_v40  ;;  %v513_v52 = vadd.f32 %v512_v49, %v511_v44  ;;  %v495_v56 = vadd.f32 %v494_v48, %v493_v43 }
 0x115   :  { %v496_v53 = vpop.f32.mrf.mxu0  ;;  %v514_v55 = vpop.f32.mrf.mxu1 }
 0x116   :  { %446 = vst [vmem:[#allocation8] sm:$0xff] %v445_v50   ;;  %469 = vst [vmem:[#allocation8 + $0x18] sm:$0xff] %v460_v51   ;;  %v322_v62 = vadd.f32 %v513_v52, %v107_v54  ;;  %v298_v2 = vadd.f32 %v495_v56, %v101_v57 }
 0x117   :  { %v497_v59 = vpop.f32.mrf.mxu0  ;;  %v515_v61 = vpop.f32.mrf.mxu1 }
 0x118   :  { %v498_v63 = vadd.f32 %v497_v59, %v496_v53  ;;  %v516_v0 = vadd.f32 %v515_v61, %v514_v55 }
 0x119   :  { %v499_v1 = vpop.f32.mrf.mxu0 }
 0x11a   :  { %v301_v3 = vadd.f32 %v498_v63, %v102_v58  ;;  %v325_v4 = vadd.f32 %v516_v0, %v108_v60 }
 0x11b   :  { %v500_v5 = vpop.f32.mrf.mxu0 }
 0x11c   :  { %v450_v6 = vpack.c.bf16 %v301_v3, %v298_v2  ;;  %v465_v7 = vpack.c.bf16 %v325_v4, %v322_v62  ;;  %v501_v9 = vadd.f32 %v500_v5, %v499_v1 }
 0x11d   :  { %v502_v8 = vpop.f32.mrf.mxu0 }
 0x11e   :  { %467 = vst [vmem:[#allocation8 + $0x8] sm:$0xff] %v450_v6   ;;  %470 = vst [vmem:[#allocation8 + $0x20] sm:$0xff] %v465_v7   ;;  %v306_v14 = vadd.f32 %v501_v9, %v103_v10 }
 0x11f   :  { %v503_v12 = vpop.f32.mrf.mxu0 }
 0x120   :  { %v504_v13 = vadd.f32 %v503_v12, %v502_v8 }
 0x122   :  { %v309_v15 = vadd.f32 %v504_v13, %v104_v11 }
 0x124   :  { %v455_v16 = vpack.c.bf16 %v309_v15, %v306_v14 }
 0x126   :  { %468 = vst [vmem:[#allocation8 + $0x10] sm:$0xff] %v455_v16  }
 0x127   :  { %643 = shalt.err (!%p640_p5)
}
 0x128   :  { %389 = dma.vmem_to_hbm [thread:$0]  %s384_s2, 640, %s707_s3, [#allocation4], %s659_s15, %s659_s15, %s660_s16  }
 0x129   :  { %656 = dma.done.wait [#allocation4], 640  }
 0x12a   :  { %657 = vsyncadd [#allocation4], 4294966656 }
 0x12b   :  { %393 = vsyncpa [#allocation3], 1 }
 0x12c   :  { %394 = vsyncpa [#allocation6], 1 }
 0x12d   :  { %395 = vsyncpa [#allocation4], 1 }

</bundles_post_ra>
